<compile_context>
chip_gen: v6e
topology: v6e:2x2x1
jax: 0.10.0
libtpu: 0.0.40
codegen_flags: <defaults>
</compile_context>

<pallas_src>
import functools

import jax
import jax.numpy as jnp
from jax import lax
from jax.experimental import pallas as pl
from jax.experimental.pallas import tpu as pltpu


def _round_up(x, m):
    return ((x + m - 1) // m) * m


def _pick_tile(n, align, max_tile):
    """Pick (tile, padded_extent): tile a multiple of `align`, <= max_tile.

    Prefers the largest tile that exactly divides the `align`-rounded extent
    (zero extra padding); falls back to `max_tile` with padding if the only
    exact divisors are tiny (per-step overhead would dominate).
    """
    padded = _round_up(n, align)
    if padded <= max_tile:
        return padded, padded
    min_tile = max(align, max_tile // 4)
    for t in range(max_tile, 0, -align):
        if t >= min_tile and padded % t == 0:
            return t, padded
    return max_tile, _round_up(n, max_tile)


def _attn_sdp_small_kernel(x_ref, wq_ref, bq_ref, wk_ref, bk_ref, a_ref):
    # One program per class; x is the full (N, L) array, scale pre-folded into Wq/bq.
    x = x_ref[...]
    q = jnp.dot(x, wq_ref[0], preferred_element_type=jnp.float32) + bq_ref[0]
    k = jnp.dot(x, wk_ref[0], preferred_element_type=jnp.float32) + bk_ref[0]
    a_ref[0] = lax.dot_general(
        q, k,
        dimension_numbers=(((1,), (1,)), ((), ())),
        preferred_element_type=jnp.float32,
    )


def _attn_sdp_tiled_kernel(xr_ref, xc_ref, wq_ref, bq_ref, wk_ref, bk_ref, a_ref, q_sc):
    # q depends only on (class, row-tile): compute once per row tile, reuse for
    # all column tiles (inner grid axis j is "arbitrary" so the scratch carries).
    @pl.when(pl.program_id(2) == 0)
    def _():
        q_sc[...] = (
            jnp.dot(xr_ref[...], wq_ref[0], preferred_element_type=jnp.float32)
            + bq_ref[0]
        )

    k = jnp.dot(xc_ref[...], wk_ref[0], preferred_element_type=jnp.float32) + bk_ref[0]
    # (TM, D) x (TN, D) contracting D -> (TM, TN); no explicit transpose of k.
    a_ref[0] = lax.dot_general(
        q_sc[...], k,
        dimension_numbers=(((1,), (1,)), ((), ())),
        preferred_element_type=jnp.float32,
    )


def attn_net_sdp(x, wq, bq, wk, bk, *, n_classes, D, small_n_threshold=512):
    """Forward of Attn_Net_SDP.

    x:  (N, L) float32
    wq, wk: (D*n_classes, L)  -- PyTorch nn.Linear weight layout (out, in)
    bq, bk: (D*n_classes,)
    returns (A, x) with A: (n_classes, N, N)
    """
    N, L = x.shape
    scale = float(D) ** (-0.5)

    # Per-class weight layout (C, L, D) / biases (C, 1, D); scale folded into q side.
    wq_c = jnp.transpose(wq.reshape(n_classes, D, L), (0, 2, 1)) * scale
    bq_c = bq.reshape(n_classes, 1, D) * scale
    wk_c = jnp.transpose(wk.reshape(n_classes, D, L), (0, 2, 1))
    bk_c = bk.reshape(n_classes, 1, D)

    if N <= small_n_threshold:
        # Fast path: no padding, no slice; one program per class with full-array blocks.
        a = pl.pallas_call(
            _attn_sdp_small_kernel,
            out_shape=jax.ShapeDtypeStruct((n_classes, N, N), jnp.float32),
            grid=(n_classes,),
            in_specs=[
                pl.BlockSpec((N, L), lambda c: (0, 0)),       # x (full array)
                pl.BlockSpec((1, L, D), lambda c: (c, 0, 0)),  # Wq[c] (scaled)
                pl.BlockSpec((1, 1, D), lambda c: (c, 0, 0)),  # bq[c] (scaled)
                pl.BlockSpec((1, L, D), lambda c: (c, 0, 0)),  # Wk[c]
                pl.BlockSpec((1, 1, D), lambda c: (c, 0, 0)),  # bk[c]
            ],
            out_specs=pl.BlockSpec((1, N, N), lambda c: (c, 0, 0)),
            compiler_params=pltpu.CompilerParams(
                dimension_semantics=("parallel",),
                vmem_limit_bytes=32 * 1024 * 1024,
            ),
        )(x, wq_c, bq_c, wk_c, bk_c)
        return a, x

    # Tiled path (large N): asymmetric tiles, decoupled row/col padding.
    TM, rows_pad = _pick_tile(N, 8, 256)     # sublane axis: multiple of 8
    TN, cols_pad = _pick_tile(N, 128, 512)   # lane axis: multiple of 128 (unmasked vst)
    x_rows = x if rows_pad == N else jnp.pad(x, ((0, rows_pad - N), (0, 0)))
    x_cols = x if cols_pad == N else jnp.pad(x, ((0, cols_pad - N), (0, 0)))

    grid = (n_classes, rows_pad // TM, cols_pad // TN)

    a_pad = pl.pallas_call(
        _attn_sdp_tiled_kernel,
        out_shape=jax.ShapeDtypeStruct((n_classes, rows_pad, cols_pad), jnp.float32),
        grid=grid,
        in_specs=[
            pl.BlockSpec((TM, L), lambda c, i, j: (i, 0)),       # x rows -> q tile
            pl.BlockSpec((TN, L), lambda c, i, j: (j, 0)),       # x rows -> k tile
            pl.BlockSpec((1, L, D), lambda c, i, j: (c, 0, 0)),  # Wq[c] (scaled)
            pl.BlockSpec((1, 1, D), lambda c, i, j: (c, 0, 0)),  # bq[c] (scaled)
            pl.BlockSpec((1, L, D), lambda c, i, j: (c, 0, 0)),  # Wk[c]
            pl.BlockSpec((1, 1, D), lambda c, i, j: (c, 0, 0)),  # bk[c]
        ],
        out_specs=pl.BlockSpec((1, TM, TN), lambda c, i, j: (c, i, j)),
        scratch_shapes=[pltpu.VMEM((TM, D), jnp.float32)],       # hoisted q tile
        compiler_params=pltpu.CompilerParams(
            # j carries the q scratch across column tiles -> "arbitrary";
            # c and i keep megacore parallelism on v7x.
            dimension_semantics=("parallel", "parallel", "arbitrary"),
            vmem_limit_bytes=32 * 1024 * 1024,
        ),
    )(x_rows, x_cols, wq_c, bq_c, wk_c, bk_c)

    if rows_pad == N and cols_pad == N:
        a = a_pad                    # no padding -> no HBM->HBM slice copy
    else:
        a = a_pad[:, :N, :N]         # padded region holds bias-derived garbage; drop it
    # PyTorch forward returns (A, x); dropout p=0.0 is identity, Softmax2d unused.
    return a, x


def _reference(x, wq, bq, wk, bk, n_classes, D):
    N = x.shape[0]
    q = (x @ wq.T + bq).reshape(N, n_classes, D)
    k = (x @ wk.T + bk).reshape(N, n_classes, D)
    return jnp.einsum("ncd,mcd->cnm", q, k) * (D ** -0.5)


if __name__ == "__main__":
    L, D, n_classes = 32, 16, 2
    key = jax.random.PRNGKey(0)
    kx, kwq, kbq, kwk, kbk, kx2 = jax.random.split(key, 6)

    # nn.Linear-style init: uniform(-1/sqrt(L), 1/sqrt(L)), PyTorch (out, in) layout.
    bound = 1.0 / (L ** 0.5)
    wq = jax.random.uniform(kwq, (D * n_classes, L), jnp.float32, -bound, bound)
    bq = jax.random.uniform(kbq, (D * n_classes,), jnp.float32, -bound, bound)
    wk = jax.random.uniform(kwk, (D * n_classes, L), jnp.float32, -bound, bound)
    bk = jax.random.uniform(kbk, (D * n_classes,), jnp.float32, -bound, bound)

    # --- Test 1: small-N fast path (N=8) ---
    N1 = 8
    x1 = jax.random.normal(kx, (N1, L), dtype=jnp.float32)
    A1, x1_out = attn_net_sdp(x1, wq, bq, wk, bk, n_classes=n_classes, D=D)
    A1 = jax.block_until_ready(A1)
    x1_out = jax.block_until_ready(x1_out)
    A1_ref = _reference(x1, wq, bq, wk, bk, n_classes, D)
    assert A1.shape == (n_classes, N1, N1)
    assert jnp.allclose(A1, A1_ref, atol=1e-4, rtol=1e-4)
    assert jnp.array_equal(x1_out, x1)

    # --- Test 2: exercise the tiled path (force it with a tiny threshold) ---
    N2 = 40
    x2 = jax.random.normal(kx2, (N2, L), dtype=jnp.float32)
    A2, x2_out = attn_net_sdp(
        x2, wq, bq, wk, bk, n_classes=n_classes, D=D, small_n_threshold=0
    )
    A2 = jax.block_until_ready(A2)
    x2_out = jax.block_until_ready(x2_out)
    A2_ref = _reference(x2, wq, bq, wk, bk, n_classes, D)
    assert A2.shape == (n_classes, N2, N2)
    assert jnp.allclose(A2, A2_ref, atol=1e-4, rtol=1e-4)
    assert jnp.array_equal(x2_out, x2)

    print("KERNEL_OK")
</pallas_src>

<mosaic_0001>
module attributes {stable_mosaic.version = 11 : i64} {
  func.func @_attn_sdp_small_kernel(%arg0: i32, %arg1: memref<8x32xf32, #tpu.memory_space<vmem>>, %arg2: memref<1x32x16xf32, #tpu.memory_space<vmem>>, %arg3: memref<1x1x16xf32, #tpu.memory_space<vmem>>, %arg4: memref<1x32x16xf32, #tpu.memory_space<vmem>>, %arg5: memref<1x1x16xf32, #tpu.memory_space<vmem>>, %arg6: memref<1x8x8xf32, #tpu.memory_space<vmem>>) attributes {dimension_semantics = [#tpu.dimension_semantics<parallel>], iteration_bounds = array<i64: 2>, scalar_prefetch = 0 : i64, scratch_operands = 0 : i64, tpu.core_type = #tpu.core_type<tc>, window_params = [{pipeline_mode = #tpu.pipeline_mode<synchronous>, transform_indices = @transform_0, window_bounds = array<i64: 8, 32>}, {transform_indices = @transform_1, window_bounds = array<i64: 1, 32, 16>}, {transform_indices = @transform_2, window_bounds = array<i64: 1, 1, 16>}, {transform_indices = @transform_3, window_bounds = array<i64: 1, 32, 16>}, {transform_indices = @transform_4, window_bounds = array<i64: 1, 1, 16>}, {transform_indices = @transform_5, window_bounds = array<i64: 1, 8, 8>}]} {
    %c0 = arith.constant 0 : index
    %c0_0 = arith.constant 0 : index
    %0 = vector.load %arg1[%c0, %c0_0] : memref<8x32xf32, #tpu.memory_space<vmem>>, vector<8x32xf32>
    %c0_1 = arith.constant 0 : index
    %c0_2 = arith.constant 0 : index
    %c0_3 = arith.constant 0 : index
    %1 = vector.load %arg2[%c0_1, %c0_2, %c0_3] : memref<1x32x16xf32, #tpu.memory_space<vmem>>, vector<1x32x16xf32>
    %2 = vector.shape_cast %1 : vector<1x32x16xf32> to vector<32x16xf32>
    %cst = arith.constant dense<0.000000e+00> : vector<8x16xf32>
    %3 = tpu.matmul %0, %2, %cst {dimension_numbers = #tpu.dot_dimension_numbers<[1], [0], [0], [1], [0, 0, 1, 1], [], []>} : vector<8x32xf32>, vector<32x16xf32>, vector<8x16xf32> -> vector<8x16xf32>
    %c0_4 = arith.constant 0 : index
    %c0_5 = arith.constant 0 : index
    %c0_6 = arith.constant 0 : index
    %4 = vector.load %arg3[%c0_4, %c0_5, %c0_6] : memref<1x1x16xf32, #tpu.memory_space<vmem>>, vector<1x1x16xf32>
    %5 = vector.shape_cast %4 : vector<1x1x16xf32> to vector<1x16xf32>
    %6 = vector.broadcast %5 : vector<1x16xf32> to vector<8x16xf32>
    %7 = arith.addf %3, %6 : vector<8x16xf32>
    %c0_7 = arith.constant 0 : index
    %c0_8 = arith.constant 0 : index
    %c0_9 = arith.constant 0 : index
    %8 = vector.load %arg4[%c0_7, %c0_8, %c0_9] : memref<1x32x16xf32, #tpu.memory_space<vmem>>, vector<1x32x16xf32>
    %9 = vector.shape_cast %8 : vector<1x32x16xf32> to vector<32x16xf32>
    %cst_10 = arith.constant dense<0.000000e+00> : vector<8x16xf32>
    %10 = tpu.matmul %0, %9, %cst_10 {dimension_numbers = #tpu.dot_dimension_numbers<[1], [0], [0], [1], [0, 0, 1, 1], [], []>} : vector<8x32xf32>, vector<32x16xf32>, vector<8x16xf32> -> vector<8x16xf32>
    %c0_11 = arith.constant 0 : index
    %c0_12 = arith.constant 0 : index
    %c0_13 = arith.constant 0 : index
    %11 = vector.load %arg5[%c0_11, %c0_12, %c0_13] : memref<1x1x16xf32, #tpu.memory_space<vmem>>, vector<1x1x16xf32>
    %12 = vector.shape_cast %11 : vector<1x1x16xf32> to vector<1x16xf32>
    %13 = vector.broadcast %12 : vector<1x16xf32> to vector<8x16xf32>
    %14 = arith.addf %10, %13 : vector<8x16xf32>
    %cst_14 = arith.constant dense<0.000000e+00> : vector<8x8xf32>
    %15 = tpu.matmul %7, %14, %cst_14 {dimension_numbers = #tpu.dot_dimension_numbers<[1], [1], [0], [0], [0, 0, 1, 0], [], []>} : vector<8x16xf32>, vector<8x16xf32>, vector<8x8xf32> -> vector<8x8xf32>
    %c0_15 = arith.constant 0 : index
    %c0_16 = arith.constant 0 : index
    %c0_17 = arith.constant 0 : index
    %16 = vector.load %arg6[%c0_15, %c0_16, %c0_17] : memref<1x8x8xf32, #tpu.memory_space<vmem>>, vector<1x8x8xf32>
    %17 = vector.shape_cast %16 : vector<1x8x8xf32> to vector<8x8xf32>
    %18 = vector.shape_cast %15 : vector<8x8xf32> to vector<1x8x8xf32>
    tpu.vector_store %arg6[%c0_15, %c0_16, %c0_17], %18 {strides = array<i32>} : memref<1x8x8xf32, #tpu.memory_space<vmem>>, vector<1x8x8xf32>,
    return
  }
  func.func @transform_0(%arg0: i32) -> (i32, i32) {
    %c0_i32 = arith.constant 0 : i32
    %c0_i32_0 = arith.constant 0 : i32
    %c0_i32_1 = arith.constant 0 : i32
    return %c0_i32, %c0_i32_0 : i32, i32
  }
  func.func @transform_1(%arg0: i32) -> (i32, i32, i32) {
    %c0_i32 = arith.constant 0 : i32
    %c0_i32_0 = arith.constant 0 : i32
    %c0_i32_1 = arith.constant 0 : i32
    return %arg0, %c0_i32, %c0_i32_0 : i32, i32, i32
  }
  func.func @transform_2(%arg0: i32) -> (i32, i32, i32) {
    %c0_i32 = arith.constant 0 : i32
    %c0_i32_0 = arith.constant 0 : i32
    %c0_i32_1 = arith.constant 0 : i32
    return %arg0, %c0_i32, %c0_i32_0 : i32, i32, i32
  }
  func.func @transform_3(%arg0: i32) -> (i32, i32, i32) {
    %c0_i32 = arith.constant 0 : i32
    %c0_i32_0 = arith.constant 0 : i32
    %c0_i32_1 = arith.constant 0 : i32
    return %arg0, %c0_i32, %c0_i32_0 : i32, i32, i32
  }
  func.func @transform_4(%arg0: i32) -> (i32, i32, i32) {
    %c0_i32 = arith.constant 0 : i32
    %c0_i32_0 = arith.constant 0 : i32
    %c0_i32_1 = arith.constant 0 : i32
    return %arg0, %c0_i32, %c0_i32_0 : i32, i32, i32
  }
  func.func @transform_5(%arg0: i32) -> (i32, i32, i32) {
    %c0_i32 = arith.constant 0 : i32
    %c0_i32_0 = arith.constant 0 : i32
    %c0_i32_1 = arith.constant 0 : i32
    return %arg0, %c0_i32, %c0_i32_0 : i32, i32, i32
  }
}

</mosaic_0001>

<bundles_post_ra>
// kernel: tpu_custom_call.1
= control target key start
LH: loop header
LB: loop body
LE: loop exit
PB: predicated region body
PF: predicated region fallthrough
CT: control target
= control target key end

     0   :  { %10 = vsyncpa [#allocation3], 0  ;;  %s935_s0 = inlined_call_operand.vmem [shape: f32[8,32], index: 0, kind: input, shape index: {}]   ;;  %s936_s1 = inlined_call_operand.vmem [shape: f32[2,32,16], index: 1, kind: input, shape index: {}]   ;;  %s937_s2 = inlined_call_operand.vmem [shape: f32[2,1,16], index: 2, kind: input, shape index: {}]   ;;  %s938_s3 = inlined_call_operand.vmem [shape: f32[2,32,16], index: 3, kind: input, shape index: {}]   ;;  %s939_s4 = inlined_call_operand.vmem [shape: f32[2,1,16], index: 4, kind: input, shape index: {}]   ;;  %s940_s5 = inlined_call_operand.hbm [shape: f32[2,8,8], index: 5, kind: output, shape index: {}]  }
   0x1   :  { %12 = vsyncpa [#allocation3 + $0x1], 0  ;;  %s816_s18 = smov 0   ;;  %s818_s19 = smov 0  }
   0x2   :  { %s820_s20 = smov 0   ;;  %s822_s21 = smov 0  }
   0x3 LB: > { %s837_s22 = sadd.s32 4294967295, %s781_s21   ;;  %s620_s23 = sadd.s32 4294967294, %s781_s21   ;;  %s781_s21 = sphi %s822_s21, %s946_s21   ;;  %s777_s20 = sphi %s820_s20, %s945_s20   ;;  %s773_s19 = sphi %s818_s19, %s944_s19   ;;  %s769_s18 = sphi %s816_s18, %s943_s18  }
   0x4   : > { %s841_s24 = sadd.s32 1, %s781_s21   ;;  %s150_s25 = sadd.s32 1, %s777_s20 }
   0x5   : > { %s147_s26 = ssub.s32 %s781_s21, %s841_s24  ;;  %p160_p0 = scmp.ne.s32.totalorder %s777_s20, %s773_s19 }
   0x6   : > { %p148_p1 = scmp.eq.s32.totalorder %s147_s26, 0  ;;  %p161_p2 = scmp.eq.s32.totalorder %s837_s22, 1 }
   0x7   : > { %p166_p3 = scmp.ne.s32.totalorder %s773_s19, %s769_s18  ;;  %p167_p4 = scmp.eq.s32.totalorder %s620_s23, 1 }
   0x8   : > { %s852_s27 = scalar_select %p148_p1, %s777_s20, %s150_s25  }
   0x9   : > { %p854_p5 = por %p161_p2, %p160_p0  ;;  %p858_p6 = por %p167_p4, %p166_p3 }
   0xa   : > { %p623_p7 = scmp.ge.s32.totalorder %s781_s21, 1  ;;  %p216_p8 = scmp.lt.s32.totalorder %s781_s21, 3 }
   0xc   : > { %p217_p9 = pnand %p623_p7, %p216_p8 }
   0xd   : > { %p255_p10 = scmp.lt.s32.totalorder (!%p217_p9), %s837_s22, 1  ;;  %s636_s8 = sshll.u32 (!%p217_p9), %s837_s22, 7 }
   0xe   : > { %220 = sbr.rel (%p217_p9) target bundleno = 436 (0x1b4), region = 40 }
  0x13   : > { %v783_v0 = vmov 0.0   ;;  %s866_s30 = scalar_select %p255_p10, %s837_s22, 1  ;;  %vm784_vm0 = vmmov 0   ;;  %v271_v9 = vld [vmem:[%s935_s0] sm:$0xff]  ;;  %vm283_vm1 = vcmask 261120   ;;  %vm438_vm2 = vcmask 130048  }
  0x14   : > { %664 = vmatprep.subr.mxu1 %v783_v0  ;;  %653 = vmatprep.subr.mxu0 %v783_v0  ;;  %vm515_vm3 = vcmask 64512   ;;  %s785_s22 = smov [#allocation2]  }
  0x15   : > { %672 = vmatprep.mubr.msk.f32.mxu1 %vm784_vm0, %v783_v0  ;;  %661 = vmatprep.mubr.msk.f32.mxu0 %vm784_vm0, %v783_v0  ;;  %s639_s6 = sshll.u32 %s866_s30, 5  ;;  %s270_s17 = scalar_lea.vmem %s939_s4, %s866_s30 }
  0x16   : > { %s267_s9 = scalar_lea.vmem %s938_s3, %s639_s6  ;;  %s259_s12 = scalar_lea.vmem %s936_s1, %s639_s6  ;;  %v631_v10 = vld [vmem:[%s270_s17] ss:$0 sm:$0xff] }
  0x17   : > { %v360_v1 = vld [vmem:[%s267_s9 + $0x18] sm:$0xff]  ;;  %v359_v3 = vld [vmem:[%s267_s9 + $0x10] sm:$0xff]  ;;  %v358_v5 = vld [vmem:[%s267_s9 + $0x8] sm:$0xff]  ;;  %s262_s26 = scalar_lea.vmem %s937_s2, %s866_s30  ;;  %s252_s6 = sand.u32 1, %s773_s19  }
  0x18   : > { %v275_v2 = vld [vmem:[%s259_s12 + $0x18] sm:$0xff]  ;;  %665 = vmatpush3.msra.mxu1 %v360_v1  ;;  %v274_v4 = vld [vmem:[%s259_s12 + $0x10] sm:$0xff]  ;;  %v273_v6 = vld [vmem:[%s259_s12 + $0x8] sm:$0xff]  ;;  %s624_s7 = sshll.u32 %s252_s6, 3  ;;  %s518_s13 = scalar_lea.sflag [#allocation3], %s252_s6 }
  0x19   : > { %654 = vmatpush3.msra.mxu0 %v275_v2  ;;  %666 = vmatprep.subr.mxu1 %v783_v0  ;;  %v357_v7 = vld [vmem:[%s267_s9] sm:$0xff]  ;;  %s254_s9 = scalar_lea.vmem [#allocation2], %s624_s7  ;;  %s725_s15 = sshll.u32 %s785_s22, 4  ;;  %s726_s15 = int_to_ptr.vmem [resolvable:$false] %s725_s15 }
  0x1a   : > { %655 = vmatprep.subr.mxu0 %v783_v0  ;;  %667 = vmatpush3.msra.mxu1 %v359_v3  ;;  %v272_v8 = vld [vmem:[%s259_s12] sm:$0xff]  ;;  %s531_s10 = sshll.u32 %s254_s9, 4  ;;  %s894_s12 = scalar_lea.hbm %s940_s5, %s636_s8  ;;  %s896_s10 = int_to_ptr.vmem [resolvable:$true] %s531_s10 }
  0x1b   : > { %656 = vmatpush3.msra.mxu0 %v274_v4  ;;  %668 = vmatprep.subr.mxu1 %v783_v0  ;;  %v629_v11 = vld [vmem:[%s262_s26] ss:$0 sm:$0xff]  ;;  %s721_s14 = scalar_lea.vmem %s896_s10, 128  ;;  %s727_s16 = scalar_lea.vmem %s726_s15, 256 }
  0x1c   : > { %657 = vmatprep.subr.mxu0 %v783_v0  ;;  %669 = vmatpush3.msra.mxu1 %v358_v5  ;;  %p722_p11 = scmp.ne.s32.totalorder %s896_s10, %s721_s14  ;;  %p728_p0 = scmp.lt.s32.totalorder %s896_s10, %s726_s15 }
  0x1d   : > { %658 = vmatpush3.msra.mxu0 %v273_v6  ;;  %670 = vmatprep.subr.mxu1 %v783_v0  ;;  %p729_p1 = scmp.lt.s32.totalorder %s727_s16, %s721_s14 }
  0x1e   : > { %659 = vmatprep.subr.mxu0 %v783_v0  ;;  %671 = vmatpush3.msra.mxu1 %v357_v7  ;;  %p723_p12 = pnand %p722_p11, %p854_p5 }
  0x1f   : > { %660 = vmatpush3.msra.mxu0 %v272_v8  ;;  %673 = vmatmul.mubr.msk.f32.vlgmr.msra.gmra.mxu1 %vm283_vm1, %v271_v9  ;;  %p730_p2 = por %p729_p1, %p728_p0 }
  0x20   : > { %662 = vmatmul.mubr.msk.f32.vlgmr.msra.gmra.mxu0 %vm283_vm1, %v271_v9  ;;  %675 = vmatprep.subr.mxu0 %v783_v0  ;;  %p724_p13 = pneg %p723_p12 }
  0x21   : > { %677 = vmatprep.mubr.msk.f32.mxu0 %vm784_vm0, %v783_v0 }
  0x22   : > { %p731_p3 = pnand %p730_p2, %p724_p13 }
  0xdf   : > { %v434_v12 = vpop.f32.mrf.mxu1 }
  0xe0   : > { %v353_v13 = vpop.f32.mrf.mxu0  ;;  %v435_v14 = vadd.f32 %v631_v10, %v434_v12 }
  0xe1   : > { %v354_v15 = vadd.f32 %v629_v11, %v353_v13  ;;  %v674_v16 = vpop.f32.mrf.mxu1 }
  0xe2   : > { %v663_v17 = vpop.f32.mrf.mxu0  ;;  %676 = vmatpush3.xpose.msk.msra.mxu0 %vm438_vm2, %v435_v14 }
  0xe5   : > { %678 = vmatmul.mubr.msk.f32.vlgmr.msra.gmra.mxu0 %vm438_vm2, %v354_v15 }
 0x1a5   : > { %v511_v18 = vpop.f32.mrf.mxu0 }
 0x1a6   : > { %516 = vst.msk [vmem:[%s254_s9] sm:$0xff] %vm515_vm3, %v511_v18 }
 0x1a7   : > { %v679_v19 = vpop.f32.mrf.mxu0 }
 0x1a8   : > { %734 = shalt.err (!%p731_p3)
}
 0x1a9   : > { %s735_s17 = scalar_lea.hbm %s894_s12, 128  ;;  %s739_s26 = scalar_lea.hbm %s940_s5, 256 }
 0x1aa   : > { %p736_p4 = scmp.ne.s32.totalorder %s894_s12, %s735_s17  ;;  %p740_p9 = scmp.lt.s32.totalorder %s894_s12, %s940_s5 }
 0x1ab   : > { %p741_p10 = scmp.lt.s32.totalorder %s739_s26, %s735_s17 }
 0x1ac   : > { %p737_p7 = pnand %p736_p4, %p854_p5 }
 0x1ad   : > { %p742_p11 = por %p741_p10, %p740_p9 }
 0x1ae   : > { %p738_p8 = pneg %p737_p7 }
 0x1b0   : > { %p743_p12 = pnand %p742_p11, %p738_p8 }
 0x1b2   : > { %746 = shalt.err (!%p743_p12)
}
 0x1b3   : > { %680 = dma.vmem_to_hbm [thread:$0]  (%p854_p5), %s896_s10, 128, %s894_s12, %s518_s13  }
 0x1b4 PF: > { %p686_p13 = scmp.ge.s32.totalorder %s781_s21, 2  ;;  %s543_s8 = sand.u32 1, %s769_s18  }
 0x1b5   : > { %s544_s9 = scalar_lea.sflag [#allocation3], %s543_s8 }
 0x1b6   : > { %p683_p0 = pnand %p686_p13, %p858_p6 }
 0x1b8   : > { %p684_p1 = pneg %p683_p0 }
 0x1ba   : > { %764 = dma.done.wait (%p684_p1), %s544_s9, 128  }
 0x1bb   : > { %766 = vsyncadd (%p684_p1), %s544_s9, 4294967168  ;;  %p15_p2 = scmp.ge.s32.totalorder %s841_s24, 4   ;;  %s943_s18 = smov %s773_s19 }
 0x1bc   : > { %s944_s19 = smov %s777_s20  ;;  %s945_s20 = smov %s852_s27 }
 0x1bd   : > { %s946_s21 = smov %s841_s24  ;;  %17 = sbr.rel (!%p15_p2) target bundleno = 3 (0x3), region = 84 }
 0x1c2   :  { %549 = vsyncpa [#allocation3], 1 }
 0x1c3   :  { %551 = vsyncpa [#allocation3 + $0x1], 1 }

</bundles_post_ra>
